<compile_context>
chip_gen: v5e
topology: v5e:2x2
jax: 0.10.0
libtpu: 0.0.40
codegen_flags: <defaults>
</compile_context>

<pallas_src>
import jax
import jax.numpy as jnp
from jax.experimental import pallas as pl
from jax.experimental.pallas import tpu as pltpu
import numpy as np


def rnn_softmax_kernel(x_ref, h0_ref, params_ref, out_ref, h_final_ref):
    """Single-invocation RNN + softmax kernel (whole problem in VMEM).

    x_ref      : (T*B, I)    input, time-major flattened in the wrapper
    h0_ref     : (B, H)      initial hidden state
    params_ref : (I+H+1, H)  concat of [W_ih^T ; W_hh^T ; (b_ih+b_hh)]
    out_ref    : (T*B, H)    softmax(h_t) over hidden dim, time-major
    h_final_ref: (B, H)      raw final hidden state
    """
    TB, I = x_ref.shape
    B, H = h0_ref.shape
    T = TB // B

    # Static sublane-aligned slices of the fused parameter slab (zero-cost views).
    w_ih_t = params_ref[0:I, :]            # (I, H)
    w_hh_t = params_ref[I:I + H, :]        # (H, H)
    b = params_ref[I + H:I + H + 1, :]     # (1, H)

    # Hoisted input projection: one (T*B, I) x (I, H) MXU push covers every
    # time step; bias is added once here (no per-step broadcast in the loop).
    zx = jnp.dot(x_ref[...], w_ih_t,
                 preferred_element_type=jnp.float32) + b      # (T*B, H)

    h = h0_ref[...]

    # Sequential recurrence. T is a small static trace-time constant, so the
    # Python loop fully unrolls with static, contiguous slices of zx. Every
    # h_t stays in vregs (whole slab is ~2 KiB, half a vreg worth of data).
    hs = []
    for t in range(T):
        h = jnp.tanh(zx[t * B:(t + 1) * B, :]
                     + jnp.dot(h, w_hh_t, preferred_element_type=jnp.float32))
        hs.append(h)

    h_final_ref[...] = h                   # raw final hidden (PyTorch semantics)

    # Bulk softmax over the hidden dim on the stacked register value, then a
    # single store to the output slab (no intermediate VMEM round-trip).
    h_all = jnp.concatenate(hs, axis=0)    # (T*B, H), time-major
    m = jnp.max(h_all, axis=-1, keepdims=True)
    e = jnp.exp(h_all - m)
    out_ref[...] = e / jnp.sum(e, axis=-1, keepdims=True)   # exact divide


def agent_forward(x, hidden, w_ih, w_hh, b_ih, b_hh):
    """x: (B, T, I) f32, hidden: (1, B, H) f32.

    Returns (output (B, T, H) softmaxed, hidden (1, B, H) raw final state).
    """
    B, T, I = x.shape
    H = w_ih.shape[0]

    # Tiny wrapper-side layout prep (all arrays are ~1-4 KiB; noise).
    x_tb = jnp.transpose(x.astype(jnp.float32), (1, 0, 2)).reshape(T * B, I)
    h0 = hidden.reshape(B, H).astype(jnp.float32)
    params = jnp.concatenate(
        [w_ih.T.astype(jnp.float32),                        # (I, H)
         w_hh.T.astype(jnp.float32),                        # (H, H)
         (b_ih + b_hh).reshape(1, H).astype(jnp.float32)],  # (1, H)
        axis=0)                                             # (I+H+1, H)

    vmem = pl.BlockSpec(memory_space=pltpu.MemorySpace.VMEM)
    out_tb, h_final = pl.pallas_call(
        rnn_softmax_kernel,
        out_shape=(jax.ShapeDtypeStruct((T * B, H), jnp.float32),
                   jax.ShapeDtypeStruct((B, H), jnp.float32)),
        in_specs=[vmem, vmem, vmem],
        out_specs=(vmem, vmem),
    )(x_tb, h0, params)

    out = jnp.transpose(out_tb.reshape(T, B, H), (1, 0, 2))  # back to batch_first
    return out, h_final.reshape(1, B, H)


def reference_forward(x, hidden, w_ih, w_hh, b_ih, b_hh):
    """Pure-JAX reference of the same forward pass for verification."""
    B = x.shape[0]
    H = w_ih.shape[0]
    h0 = hidden.reshape(B, H)

    def step(h, x_t):
        h_new = jnp.tanh(x_t @ w_ih.T + b_ih + h @ w_hh.T + b_hh)
        return h_new, h_new

    x_tbi = jnp.transpose(x, (1, 0, 2))
    h_last, hs = jax.lax.scan(step, h0, x_tbi)
    out = jnp.transpose(hs, (1, 0, 2))
    out = jax.nn.softmax(out, axis=-1)
    return out, h_last.reshape(1, B, H)


if __name__ == "__main__":
    # Small shapes implied by the module: batch=2, seq=8, input_size=16, hidden_size=32.
    B, T, I, H = 2, 8, 16, 32

    key = jax.random.PRNGKey(0)
    k_x, k_wih, k_whh, k_bih, k_bhh, k_fc = jax.random.split(key, 6)

    # Deterministic parameter init mimicking PyTorch nn.RNN: U(-1/sqrt(H), 1/sqrt(H)).
    bound = 1.0 / np.sqrt(H)
    w_ih = jax.random.uniform(k_wih, (H, I), jnp.float32, -bound, bound)
    w_hh = jax.random.uniform(k_whh, (H, H), jnp.float32, -bound, bound)
    b_ih = jax.random.uniform(k_bih, (H,), jnp.float32, -bound, bound)
    b_hh = jax.random.uniform(k_bhh, (H,), jnp.float32, -bound, bound)
    # self.fc = nn.Linear(H, 3) is defined but unused in forward(); init only.
    fc_w = jax.random.uniform(k_fc, (3, H), jnp.float32, -bound, bound)  # noqa: F841

    x = jax.random.normal(k_x, (B, T, I), dtype=jnp.float32)
    hidden0 = jnp.zeros((1, B, H), dtype=jnp.float32)   # init_hidden() semantics (zeros)

    out, h_n = agent_forward(x, hidden0, w_ih, w_hh, b_ih, b_hh)
    out = jax.block_until_ready(out)
    h_n = jax.block_until_ready(h_n)

    ref_out, ref_h = reference_forward(x, hidden0, w_ih, w_hh, b_ih, b_hh)
    np.testing.assert_allclose(np.asarray(out), np.asarray(ref_out), atol=1e-5, rtol=1e-4)
    np.testing.assert_allclose(np.asarray(h_n), np.asarray(ref_h), atol=1e-5, rtol=1e-4)

    print("KERNEL_OK")
</pallas_src>

<mosaic_0001>
module attributes {stable_mosaic.version = 11 : i64} {
  func.func @rnn_softmax_kernel(%arg0: memref<16x16xf32, #tpu.memory_space<vmem>>, %arg1: memref<2x32xf32, #tpu.memory_space<vmem>>, %arg2: memref<49x32xf32, #tpu.memory_space<vmem>>, %arg3: memref<16x32xf32, #tpu.memory_space<vmem>>, %arg4: memref<2x32xf32, #tpu.memory_space<vmem>>) attributes {dimension_semantics = [], scalar_prefetch = 0 : i64, scratch_operands = 0 : i64, tpu.core_type = #tpu.core_type<tc>} {
    %c0 = arith.constant 0 : index
    %c0_0 = arith.constant 0 : index
    %0 = vector.load %arg2[%c0, %c0_0] : memref<49x32xf32, #tpu.memory_space<vmem>>, vector<16x32xf32>
    %c16 = arith.constant 16 : index
    %c0_1 = arith.constant 0 : index
    %1 = vector.load %arg2[%c16, %c0_1] : memref<49x32xf32, #tpu.memory_space<vmem>>, vector<32x32xf32>
    %c48 = arith.constant 48 : index
    %c0_2 = arith.constant 0 : index
    %2 = vector.load %arg2[%c48, %c0_2] : memref<49x32xf32, #tpu.memory_space<vmem>>, vector<1x32xf32>
    %c0_3 = arith.constant 0 : index
    %c0_4 = arith.constant 0 : index
    %3 = vector.load %arg0[%c0_3, %c0_4] : memref<16x16xf32, #tpu.memory_space<vmem>>, vector<16x16xf32>
    %cst = arith.constant dense<0.000000e+00> : vector<16x32xf32>
    %4 = tpu.matmul %3, %0, %cst {dimension_numbers = #tpu.dot_dimension_numbers<[1], [0], [0], [1], [0, 0, 1, 1], [], []>} : vector<16x16xf32>, vector<16x32xf32>, vector<16x32xf32> -> vector<16x32xf32>
    %5 = vector.broadcast %2 : vector<1x32xf32> to vector<16x32xf32>
    %6 = arith.addf %4, %5 : vector<16x32xf32>
    %c0_5 = arith.constant 0 : index
    %c0_6 = arith.constant 0 : index
    %7 = vector.load %arg1[%c0_5, %c0_6] : memref<2x32xf32, #tpu.memory_space<vmem>>, vector<2x32xf32>
    %8 = vector.extract_strided_slice %6 {offsets = [0, 0], sizes = [2, 32], strides = [1, 1]} : vector<16x32xf32> to vector<2x32xf32>
    %cst_7 = arith.constant dense<0.000000e+00> : vector<2x32xf32>
    %9 = tpu.matmul %7, %1, %cst_7 {dimension_numbers = #tpu.dot_dimension_numbers<[1], [0], [0], [1], [0, 0, 1, 1], [], []>} : vector<2x32xf32>, vector<32x32xf32>, vector<2x32xf32> -> vector<2x32xf32>
    %10 = arith.addf %8, %9 : vector<2x32xf32>
    %11 = math.tanh %10 : vector<2x32xf32>
    %12 = vector.extract_strided_slice %6 {offsets = [2, 0], sizes = [2, 32], strides = [1, 1]} : vector<16x32xf32> to vector<2x32xf32>
    %cst_8 = arith.constant dense<0.000000e+00> : vector<2x32xf32>
    %13 = tpu.matmul %11, %1, %cst_8 {dimension_numbers = #tpu.dot_dimension_numbers<[1], [0], [0], [1], [0, 0, 1, 1], [], []>} : vector<2x32xf32>, vector<32x32xf32>, vector<2x32xf32> -> vector<2x32xf32>
    %14 = arith.addf %12, %13 : vector<2x32xf32>
    %15 = math.tanh %14 : vector<2x32xf32>
    %16 = vector.extract_strided_slice %6 {offsets = [4, 0], sizes = [2, 32], strides = [1, 1]} : vector<16x32xf32> to vector<2x32xf32>
    %cst_9 = arith.constant dense<0.000000e+00> : vector<2x32xf32>
    %17 = tpu.matmul %15, %1, %cst_9 {dimension_numbers = #tpu.dot_dimension_numbers<[1], [0], [0], [1], [0, 0, 1, 1], [], []>} : vector<2x32xf32>, vector<32x32xf32>, vector<2x32xf32> -> vector<2x32xf32>
    %18 = arith.addf %16, %17 : vector<2x32xf32>
    %19 = math.tanh %18 : vector<2x32xf32>
    %20 = vector.extract_strided_slice %6 {offsets = [6, 0], sizes = [2, 32], strides = [1, 1]} : vector<16x32xf32> to vector<2x32xf32>
    %cst_10 = arith.constant dense<0.000000e+00> : vector<2x32xf32>
    %21 = tpu.matmul %19, %1, %cst_10 {dimension_numbers = #tpu.dot_dimension_numbers<[1], [0], [0], [1], [0, 0, 1, 1], [], []>} : vector<2x32xf32>, vector<32x32xf32>, vector<2x32xf32> -> vector<2x32xf32>
    %22 = arith.addf %20, %21 : vector<2x32xf32>
    %23 = math.tanh %22 : vector<2x32xf32>
    %24 = vector.extract_strided_slice %6 {offsets = [8, 0], sizes = [2, 32], strides = [1, 1]} : vector<16x32xf32> to vector<2x32xf32>
    %cst_11 = arith.constant dense<0.000000e+00> : vector<2x32xf32>
    %25 = tpu.matmul %23, %1, %cst_11 {dimension_numbers = #tpu.dot_dimension_numbers<[1], [0], [0], [1], [0, 0, 1, 1], [], []>} : vector<2x32xf32>, vector<32x32xf32>, vector<2x32xf32> -> vector<2x32xf32>
    %26 = arith.addf %24, %25 : vector<2x32xf32>
    %27 = math.tanh %26 : vector<2x32xf32>
    %28 = vector.extract_strided_slice %6 {offsets = [10, 0], sizes = [2, 32], strides = [1, 1]} : vector<16x32xf32> to vector<2x32xf32>
    %cst_12 = arith.constant dense<0.000000e+00> : vector<2x32xf32>
    %29 = tpu.matmul %27, %1, %cst_12 {dimension_numbers = #tpu.dot_dimension_numbers<[1], [0], [0], [1], [0, 0, 1, 1], [], []>} : vector<2x32xf32>, vector<32x32xf32>, vector<2x32xf32> -> vector<2x32xf32>
    %30 = arith.addf %28, %29 : vector<2x32xf32>
    %31 = math.tanh %30 : vector<2x32xf32>
    %32 = vector.extract_strided_slice %6 {offsets = [12, 0], sizes = [2, 32], strides = [1, 1]} : vector<16x32xf32> to vector<2x32xf32>
    %cst_13 = arith.constant dense<0.000000e+00> : vector<2x32xf32>
    %33 = tpu.matmul %31, %1, %cst_13 {dimension_numbers = #tpu.dot_dimension_numbers<[1], [0], [0], [1], [0, 0, 1, 1], [], []>} : vector<2x32xf32>, vector<32x32xf32>, vector<2x32xf32> -> vector<2x32xf32>
    %34 = arith.addf %32, %33 : vector<2x32xf32>
    %35 = math.tanh %34 : vector<2x32xf32>
    %36 = vector.extract_strided_slice %6 {offsets = [14, 0], sizes = [2, 32], strides = [1, 1]} : vector<16x32xf32> to vector<2x32xf32>
    %cst_14 = arith.constant dense<0.000000e+00> : vector<2x32xf32>
    %37 = tpu.matmul %35, %1, %cst_14 {dimension_numbers = #tpu.dot_dimension_numbers<[1], [0], [0], [1], [0, 0, 1, 1], [], []>} : vector<2x32xf32>, vector<32x32xf32>, vector<2x32xf32> -> vector<2x32xf32>
    %38 = arith.addf %36, %37 : vector<2x32xf32>
    %39 = math.tanh %38 : vector<2x32xf32>
    %c0_15 = arith.constant 0 : index
    %c0_16 = arith.constant 0 : index
    %40 = vector.load %arg4[%c0_15, %c0_16] : memref<2x32xf32, #tpu.memory_space<vmem>>, vector<2x32xf32>
    tpu.vector_store %arg4[%c0_15, %c0_16], %39 {strides = array<i32>} : memref<2x32xf32, #tpu.memory_space<vmem>>, vector<2x32xf32>,
    %41 = tpu.concatenate %11, %15, %19, %23, %27, %31, %35, %39 in 0 : vector<2x32xf32>, vector<2x32xf32>, vector<2x32xf32>, vector<2x32xf32>, vector<2x32xf32>, vector<2x32xf32>, vector<2x32xf32>, vector<2x32xf32> -> vector<16x32xf32>
    %cst_17 = arith.constant dense<0xFF800000> : vector<16xf32>
    %42 = vector.multi_reduction <maximumf>, %41, %cst_17 [1] : vector<16x32xf32> to vector<16xf32>
    %43 = vector.shape_cast %42 : vector<16xf32> to vector<16x1xf32>
    %44 = vector.broadcast %43 : vector<16x1xf32> to vector<16x32xf32>
    %45 = arith.subf %41, %44 : vector<16x32xf32>
    %46 = math.exp %45 : vector<16x32xf32>
    %cst_18 = arith.constant dense<0.000000e+00> : vector<16xf32>
    %47 = vector.multi_reduction <add>, %46, %cst_18 [1] : vector<16x32xf32> to vector<16xf32>
    %48 = vector.shape_cast %47 : vector<16xf32> to vector<16x1xf32>
    %49 = vector.broadcast %48 : vector<16x1xf32> to vector<16x32xf32>
    %50 = arith.divf %46, %49 : vector<16x32xf32>
    %c0_19 = arith.constant 0 : index
    %c0_20 = arith.constant 0 : index
    %51 = vector.load %arg3[%c0_19, %c0_20] : memref<16x32xf32, #tpu.memory_space<vmem>>, vector<16x32xf32>
    tpu.vector_store %arg3[%c0_19, %c0_20], %50 {strides = array<i32>} : memref<16x32xf32, #tpu.memory_space<vmem>>, vector<16x32xf32>,
    return
  }
}

</mosaic_0001>

<bundles_post_ra>
// kernel: tpu_custom_call.1
= control target key start
LH: loop header
LB: loop body
LE: loop exit
PB: predicated region body
PF: predicated region fallthrough
CT: control target
= control target key end

     0   :  { %10 = vsyncpa [#allocation3], 0  ;;  %vm28_vm0 = vcmask 130048   ;;  %s556_s0 = inlined_call_operand.vmem [shape: f32[16,16], index: 0, kind: input, shape index: {}]   ;;  %s557_s1 = inlined_call_operand.vmem [shape: f32[2,32], index: 1, kind: input, shape index: {}]   ;;  %s558_s2 = inlined_call_operand.vmem [shape: f32[49,32], index: 2, kind: input, shape index: {}]   ;;  %s559_s3 = inlined_call_operand.hbm [shape: f32[16,32], index: 3, kind: output, shape index: {0}]   ;;  %s560_s4 = inlined_call_operand.hbm [shape: f32[2,32], index: 4, kind: output, shape index: {1}]  }
   0x1   :  { %v23_v0 = vld [vmem:[%s558_s2 + $0x28] sm:$0xff]  ;;  %v22_v2 = vld [vmem:[%s558_s2 + $0x20] sm:$0xff]  ;;  %v21_v5 = vld [vmem:[%s558_s2 + $0x18] sm:$0xff] }
   0x2   :  { %v19_v1 = vld [vmem:[%s558_s2 + $0x8] sm:$0xff]  ;;  %75 = vmatpush.msra.mxu1 %v23_v0  ;;  %v18_v3 = vld [vmem:[%s558_s2] sm:$0xff]  ;;  %100 = vmatpush.msra.mxu2 %v23_v0 }
   0x3   :  { %49 = vmatpush.msra.mxu0 %v19_v1  ;;  %v25_v4 = vld [vmem:[%s556_s0] sm:$0xff]  ;;  %129 = vmatpush.msra.mxu3 %v23_v0 }
   0x4   :  { %76 = vmatpush.msra.mxu1 %v22_v2 }
   0x5   :  { %50 = vmatpush.msra.mxu0 %v18_v3 }
   0x6   :  { %11 = vsyncpa [#allocation5], 0  ;;  %378 = vmatmul.msk.f32.vlgmr.msra.gmra.mxu0 %vm28_vm0, %v25_v4  ;;  %v20_v6 = vld [vmem:[%s558_s2 + $0x10] sm:$0xff]  ;;  %101 = vmatpush.msra.mxu2 %v22_v2  ;;  %v58_v7 = vld [vmem:[%s557_s1] sm:$0x3]  ;;  %vm59_vm1 = vcmask 261120  }
   0x7   :  { %77 = vmatpush.msra.mxu1 %v21_v5  ;;  %130 = vmatpush.msra.mxu3 %v22_v2  ;;  %v392_v8 = vld [vmem:[%s558_s2 + $0x30] ss:$0 sm:$0xff]  ;;  %vm285_vm2 = vcmask 1041408   ;;  %vm287_vm3 = vcmask 1043456   ;;  %v26_v26 = vld [vmem:[%s556_s0 + $0x8] sm:$0xff]  ;;  %vm289_vm4 = vcmask 1045504  }
   0x8   :  { %102 = vmatpush.msra.mxu2 %v21_v5  ;;  %241 = vmatpush.msrb.mxu0 %v23_v0  ;;  %vm283_vm9 = vcmask 261126   ;;  %s469_s0 = smov [#allocation4]   ;;  %s364_s10 = sshll.u32 %s560_s4, 4  ;;  %s365_s10 = int_to_ptr.hbm [resolvable:$true] %s364_s10 }
   0x9   :  { %78 = vmatpush.msra.mxu1 %v20_v6  ;;  %131 = vmatpush.msra.mxu3 %v21_v5  ;;  %s362_s7 = sshll.u32 %s469_s0, 4  ;;  %s470_s11 = smov [#allocation2]   ;;  %s363_s7 = int_to_ptr.vmem [resolvable:$true] %s362_s7 }
   0xa   :  { %380 = vmatmul.msk.f32.vlgmr.msra.gmra.mxu1 %vm59_vm1, %v58_v7  ;;  %103 = vmatpush.msra.mxu2 %v20_v6  ;;  %s348_s12 = sshll.u32 %s470_s11, 4  ;;  %s350_s4 = sshll.u32 %s559_s3, 4  ;;  %s349_s12 = int_to_ptr.vmem [resolvable:$true] %s348_s12  ;;  %s351_s4 = int_to_ptr.hbm [resolvable:$true] %s350_s4 }
   0xb   :  { %132 = vmatpush.msra.mxu3 %v20_v6  ;;  %158 = vmatpush.msrb.mxu1 %v23_v0  ;;  %s471_s15 = smov 128   ;;  %s472_s16 = smov 8  }
   0xc   :  { %187 = vmatpush.msrb.mxu2 %v23_v0  ;;  %242 = vmatpush.msrb.mxu0 %v22_v2 }
   0xd   :  { %212 = vmatpush.msrb.mxu3 %v23_v0  ;;  %159 = vmatpush.msrb.mxu1 %v22_v2 }
   0xe   :  { %188 = vmatpush.msrb.mxu2 %v22_v2  ;;  %243 = vmatpush.msrb.mxu0 %v21_v5 }
   0xf   :  { %213 = vmatpush.msrb.mxu3 %v22_v2  ;;  %160 = vmatpush.msrb.mxu1 %v21_v5 }
  0x10   :  { %189 = vmatpush.msrb.mxu2 %v21_v5  ;;  %244 = vmatpush.msrb.mxu0 %v20_v6 }
  0x11   :  { %214 = vmatpush.msrb.mxu3 %v21_v5  ;;  %161 = vmatpush.msrb.mxu1 %v20_v6 }
  0x12   :  { %190 = vmatpush.msrb.mxu2 %v20_v6  ;;  %379 = vmatmul.msk.f32.gmra.mxu0 %vm28_vm0, %v26_v26 }
  0x13   :  { %215 = vmatpush.msrb.mxu3 %v20_v6  ;;  %270 = vmatpush.msra.mxu1 %v23_v0 }
  0x15   :  { %271 = vmatpush.msra.mxu1 %v22_v2 }
  0x17   :  { %272 = vmatpush.msra.mxu1 %v21_v5 }
  0x19   :  { %273 = vmatpush.msra.mxu1 %v20_v6 }
  0x83   :  { %v52_v9 = vpop.f32.mrf.mxu0 }
  0x84   :  { %v53_v10 = vadd.f32 %v392_v8, %v52_v9 }
  0x87   :  { %v80_v11 = vpop.f32.mrf.mxu1 }
  0x88   :  { %v83_v12 = vadd.f32 %v80_v11, %v53_v10 }
  0x8a   :  { %393 = vtanh.f32 %v83_v12 }
  0x8f   :  { %v55_v37 = vpop.f32.mrf.mxu0 }
  0x90   :  { %v394_v13 = vpop.eup %393  ;;  %v56_v40 = vadd.f32 %v392_v8, %v55_v37 }
  0x91   :  { %381 = vmatmul.msk.f32.vlgmr.msra.gmra.mxu2 %vm59_vm1, %v394_v13 }
 0x114   :  { %v105_v14 = vpop.f32.mrf.mxu2 }
 0x115   :  { %v109_v15 = vrot.slane %v105_v14, 6 }
 0x117   :  { %v111_v16 = vadd.f32 %v109_v15, %v53_v10 }
 0x119   :  { %395 = vtanh.f32 %v111_v16 }
 0x11f   :  { %v396_v17 = vpop.eup %395 }
 0x120   :  { %v114_v18 = vrot.slane %v396_v17, 2  ;;  %v286_v23 = vsel %vm285_vm2, %v394_v13, %v396_v17 }
 0x122   :  { %382 = vmatmul.msk.f32.vlgmr.msra.gmra.mxu3 %vm59_vm1, %v114_v18 }
 0x1a5   :  { %v134_v19 = vpop.f32.mrf.mxu3 }
 0x1a6   :  { %v138_v20 = vrot.slane %v134_v19, 4 }
 0x1a8   :  { %v140_v21 = vadd.f32 %v138_v20, %v53_v10 }
 0x1aa   :  { %397 = vtanh.f32 %v140_v21 }
 0x1b0   :  { %v398_v22 = vpop.eup %397 }
 0x1b1   :  { %v143_v24 = vrot.slane %v398_v22, 4  ;;  %v288_v25 = vsel %vm287_vm3, %v286_v23, %v398_v22 }
 0x1b3   :  { %383 = vmatmul.msk.f32.vlgmr.msrb.gmra.mxu1 %vm59_vm1, %v143_v24 }
 0x230   :  { %v163_v27 = vpop.f32.mrf.mxu1 }
 0x231   :  { %v167_v28 = vrot.slane %v163_v27, 2 }
 0x233   :  { %v169_v29 = vadd.f32 %v167_v28, %v53_v10 }
 0x235   :  { %399 = vtanh.f32 %v169_v29 }
 0x23b   :  { %v400_v30 = vpop.eup %399 }
 0x23c   :  { %v290_v31 = vsel %vm289_vm4, %v288_v25, %v400_v30  ;;  %v172_v32 = vrot.slane %v400_v30, 6 }
 0x23d   :  { %v294_v33 = vsel %vm59_vm1, %v290_v31, -inf }
 0x23e   :  { %295 = vmax.xlane.f32.xlu0 %v294_v33  ;;  %384 = vmatmul.msk.f32.vlgmr.msrb.gmra.mxu2 %vm59_vm1, %v172_v32 }
 0x2b1   :  { %v296_v34 = vpop.xlane.xlu0 %295 }
 0x2b2   :  { %v300_v35 = vsub.f32 %v290_v31, %v296_v34 }
 0x2b4   :  { %v302_v36 = vmul.f32 1.442695, %v300_v35 }
 0x2b6   :  { %401 = vpow2.f32 %v302_v36 }
 0x2bc   :  { %v402_v38 = vpop.eup %401 }
 0x2bd   :  { %v306_v39 = vsel %vm59_vm1, %v402_v38, 0.0 }
 0x2be   :  { %307 = vadd.xlane.f32.xlu1 %v306_v39 }
 0x2c1   :  { %v192_v41 = vpop.f32.mrf.mxu2 }
 0x2c2   :  { %v195_v42 = vadd.f32 %v192_v41, %v56_v40 }
 0x2c4   :  { %403 = vtanh.f32 %v195_v42 }
 0x2ca   :  { %v404_v43 = vpop.eup %403 }
 0x2cb   :  { %385 = vmatmul.msk.f32.vlgmr.msrb.gmra.mxu3 %vm59_vm1, %v404_v43 }
 0x331   :  { %v308_v44 = vpop.xlane.xlu1 %307 }
 0x332   :  { %405 = vrcp.f32 %v308_v44  ;;  %v323_v48 = vand.u32 2147483648, %v308_v44  ;;  %v321_v50 = vand.u32 2147483647, %v308_v44  ;;  %vm317_vm6 = vweird.f32 %v308_v44 }
 0x334   :  { %v324_v52 = vor.u32 1.1754944e-38, %v323_v48  ;;  %vm322_vm8 = vcmp.eq.f32.partialorder %v321_v50, 8.507059e+37 }
 0x338   :  { %v406_v45 = vpop.eup %405 }
 0x339   :  { %v313_v46 = vmul.f32 %v406_v45, %v308_v44  ;;  %vm318_vm5 = vweird.f32 %v406_v45 }
 0x33a   :  { %vm319_vm7 = vmor %vm317_vm6, %vm318_vm5 }
 0x33b   :  { %v314_v47 = vsub.f32 1.0, %v313_v46 }
 0x33d   :  { %v315_v49 = vmul.f32 %v406_v45, %v314_v47 }
 0x33f   :  { %v316_v51 = vadd.f32 %v406_v45, %v315_v49 }
 0x341   :  { %v320_v53 = vsel %vm319_vm7, %v406_v45, %v316_v51 }
 0x342   :  { %v325_v54 = vsel %vm322_vm8, %v324_v52, %v320_v53 }
 0x343   :  { %v326_v55 = vmul.f32 %v402_v38, %v325_v54 }
 0x345   :  { %342 = vst.msk [vmem:[#allocation2] sm:$0xff] %vm59_vm1, %v326_v55 }
 0x34e   :  { %v217_v56 = vpop.f32.mrf.mxu3 }
 0x34f   :  { %v221_v57 = vrot.slane %v217_v56, 6 }
 0x351   :  { %v223_v58 = vadd.f32 %v221_v57, %v56_v40 }
 0x353   :  { %407 = vtanh.f32 %v223_v58 }
 0x359   :  { %v408_v59 = vpop.eup %407 }
 0x35a   :  { %v226_v60 = vrot.slane %v408_v59, 2  ;;  %v291_v1 = vsel %vm285_vm2, %v404_v43, %v408_v59 }
 0x35c   :  { %386 = vmatmul.msk.f32.vlgmr.msrb.gmra.mxu0 %vm59_vm1, %v226_v60 }
 0x3d9   :  { %v246_v61 = vpop.f32.mrf.mxu0 }
 0x3da   :  { %v250_v62 = vrot.slane %v246_v61, 4 }
 0x3dc   :  { %v252_v63 = vadd.f32 %v250_v62, %v56_v40 }
 0x3de   :  { %409 = vtanh.f32 %v252_v63 }
 0x3e4   :  { %v410_v0 = vpop.eup %409 }
 0x3e5   :  { %v255_v2 = vrot.slane %v410_v0, 4  ;;  %v292_v3 = vsel %vm287_vm3, %v291_v1, %v410_v0 }
 0x3e7   :  { %387 = vmatmul.msk.f32.vlgmr.msra.gmra.mxu1 %vm59_vm1, %v255_v2 }
 0x464   :  { %v275_v4 = vpop.f32.mrf.mxu1 }
 0x465   :  { %v279_v5 = vrot.slane %v275_v4, 2 }
 0x467   :  { %v281_v6 = vadd.f32 %v279_v5, %v56_v40 }
 0x469   :  { %411 = vtanh.f32 %v281_v6 }
 0x46f   :  { %v412_v7 = vpop.eup %411 }
 0x470   :  { %v293_v8 = vsel %vm289_vm4, %v292_v3, %v412_v7  ;;  %284 = vst.msk [vmem:[#allocation4 - $0x6] sm:$0xc0] %vm283_vm9, %v412_v7 }
 0x471   :  { %v297_v9 = vsel %vm59_vm1, %v293_v8, -inf  ;;  %367 = dma.vmem_to_hbm [thread:$0]  %s363_s7, 32, %s365_s10, [#allocation5]  }
 0x472   :  { %298 = vmax.xlane.f32.xlu0 %v297_v9 }
 0x4e5   :  { %v299_v10 = vpop.xlane.xlu0 %298 }
 0x4e6   :  { %v301_v11 = vsub.f32 %v293_v8, %v299_v10 }
 0x4e8   :  { %v304_v12 = vmul.f32 1.442695, %v301_v11 }
 0x4ea   :  { %413 = vpow2.f32 %v304_v12 }
 0x4f0   :  { %v414_v13 = vpop.eup %413 }
 0x4f1   :  { %v309_v14 = vsel %vm59_vm1, %v414_v13, 0.0 }
 0x4f2   :  { %310 = vadd.xlane.f32.xlu1 %v309_v14 }
 0x565   :  { %v311_v15 = vpop.xlane.xlu1 %310 }
 0x566   :  { %415 = vrcp.f32 %v311_v15  ;;  %v338_v19 = vand.u32 2147483648, %v311_v15  ;;  %v336_v21 = vand.u32 2147483647, %v311_v15  ;;  %vm332_vm11 = vweird.f32 %v311_v15 }
 0x568   :  { %v339_v23 = vor.u32 1.1754944e-38, %v338_v19  ;;  %vm337_vm13 = vcmp.eq.f32.partialorder %v336_v21, 8.507059e+37 }
 0x56c   :  { %v416_v16 = vpop.eup %415 }
 0x56d   :  { %v328_v17 = vmul.f32 %v416_v16, %v311_v15  ;;  %vm333_vm10 = vweird.f32 %v416_v16 }
 0x56e   :  { %vm334_vm12 = vmor %vm332_vm11, %vm333_vm10 }
 0x56f   :  { %v329_v18 = vsub.f32 1.0, %v328_v17 }
 0x571   :  { %v330_v20 = vmul.f32 %v416_v16, %v329_v18 }
 0x573   :  { %v331_v22 = vadd.f32 %v416_v16, %v330_v20 }
 0x575   :  { %v335_v24 = vsel %vm334_vm12, %v416_v16, %v331_v22 }
 0x576   :  { %v340_v25 = vsel %vm337_vm13, %v339_v23, %v335_v24 }
 0x577   :  { %v341_v26 = vmul.f32 %v414_v13, %v340_v25 }
 0x579   :  { %343 = vst.msk [vmem:[#allocation2 + $0x8] sm:$0xff] %vm59_vm1, %v341_v26 }
 0x57a   :  { %356 = dma.vmem_to_hbm [thread:$0]  %s349_s12, 256, %s351_s4, [#allocation3], %s471_s15, %s471_s15, %s472_s16  }
 0x57b   :  { %465 = dma.done.wait [#allocation3], 256  }
 0x57c   :  { %466 = vsyncadd [#allocation3], 4294967040 }
 0x57d   :  { %467 = dma.done.wait [#allocation5], 32  }
 0x57e   :  { %468 = vsyncadd [#allocation5], 4294967264 }
 0x57f   :  { %376 = vsyncpa [#allocation3], 1 }
 0x580   :  { %377 = vsyncpa [#allocation5], 1 }

</bundles_post_ra>
